<compile_context>
chip_gen: v7x
topology: tpu7x:2x2x1
jax: 0.10.0
libtpu: 0.0.40
codegen_flags: <defaults>
</compile_context>

<pallas_src>
import functools

import numpy as np
import jax
import jax.numpy as jnp
from jax.experimental import pallas as pl
from jax.experimental.pallas import tpu as pltpu

ACT_DTYPE = jnp.bfloat16            # inter-layer activation storage dtype
_VMEM_BUDGET = 16 * 1024 * 1024     # GEMM working-set target (fits v5e too)
_VMEM_LIMIT = 32 * 1024 * 1024      # scoped VMEM limit (<= v7x's 64 MiB)


def _round_up(x, m):
    return (x + m - 1) // m * m


def _cdiv(a, b):
    return (a + b - 1) // b


def _pick_div(padded, candidates):
    """Largest candidate tile that divides the (128-aligned) padded dim."""
    for t in candidates:
        if padded % t == 0:
            return t
    return 128


def _tile_bytes(tm, tk, tn, out_bytes):
    # double-buffered x (bf16) + w (bf16) + out, f32 accumulator, bias.
    return (2 * tm * tk * 2 + 2 * tk * tn * 2 + 2 * tm * tn * out_bytes
            + tm * tn * 4 + 2 * tn * 8)


def _select_tiles(M, Kp, Np, n_out, out_bytes):
    """MXU tile selection.

    Prefers one K step, one M tile, 256-multiple N tiles (v6e/v7x MXUs),
    keeps the working set under ~16 MiB, and keeps >= 2 parallel grid
    iterations so both v7x TensorCores get work."""
    TN = _pick_div(Np, (512, 256, 384, 128))
    tm_full = max(16, _round_up(M, 16))
    tm_cands = ([tm_full] if tm_full <= 1024 else []) \
        + [t for t in (1024, 512, 256, 128) if t < tm_full]
    tk_cands = [Kp] + [t for t in (1024, 512, 256, 384, 128)
                       if Kp % t == 0 and t < Kp]
    TM, TK = 128, 128
    done = False
    for tk in tk_cands:
        for tm in tm_cands:
            if _tile_bytes(tm, tk, TN, out_bytes) <= _VMEM_BUDGET:
                TM, TK, done = tm, tk, True
                break
        if done:
            break
    # v7x has 2 TensorCores sharded over the parallel grid axes: keep >= 2
    # parallel iterations (harmless on v5e/v6e's single core).
    if _cdiv(M, TM) * _cdiv(n_out, TN) < 2:
        if Np >= 256:
            TN = Np // 2 if (Np // 2) % 128 == 0 else 128
        elif M > 16:
            TM = max(16, _round_up(_cdiv(M, 2), 16))
    return TM, TK, TN


# --------------------------------------------------------------------------
# Pallas GEMM kernel: bf16 operands, f32 accumulation, fused bias (+ReLU).
# --------------------------------------------------------------------------
def _gemm_kernel(x_ref, w_ref, b_ref, o_ref, acc_ref, *, relu, k_rem):
    k = pl.program_id(2)
    nk = pl.num_programs(2)

    @pl.when(k == 0)
    def _():
        # Bias folded into the accumulator init (no epilogue add/broadcast).
        acc_ref[...] = jnp.broadcast_to(b_ref[...], acc_ref.shape)

    x = x_ref[...]
    if k_rem:
        # The activation's K dim is NOT padded in HBM; zero the out-of-bounds
        # columns of the partial last K block so stale VMEM bytes cannot leak
        # into the accumulation (weight rows beyond K are zero anyway).
        lanes = jax.lax.broadcasted_iota(jnp.int32, x_ref.shape, 1)
        x = jnp.where((k < nk - 1) | (lanes < k_rem), x, jnp.zeros_like(x))
    acc_ref[...] += jnp.dot(x, w_ref[...], preferred_element_type=jnp.float32)

    @pl.when(k == nk - 1)
    def _():
        r = acc_ref[...]
        if relu:
            r = jnp.maximum(r, 0.0)
        o_ref[...] = r.astype(o_ref.dtype)


@functools.partial(jax.jit, static_argnames=("relu", "n_out", "out_dtype"))
def gemm_bias_act(x, w, b, *, relu, n_out, out_dtype=ACT_DTYPE):
    """relu((x @ w) + b), emitted at its exact (M, n_out) shape.

    x: (M, K) any float (NOT padded here; partial boundary blocks are masked
    by Pallas / in-kernel).  w: (Kw, Nw) -- ParamStore weights arrive already
    128-padded and bf16, otherwise they are padded here.  b: (1, Nw)/(Nw,)."""
    M, K = x.shape
    Kw, Nw = w.shape
    Kp = _round_up(K, 128)
    Np = _round_up(Nw, 128)
    TM, TK, TN = _select_tiles(M, Kp, Np, n_out,
                               jnp.dtype(out_dtype).itemsize)

    x = x.astype(jnp.bfloat16)
    w = w.astype(jnp.bfloat16)
    if (Kw, Nw) != (Kp, Np):
        w = jnp.pad(w, ((0, Kp - Kw), (0, Np - Nw)))
    b = b.reshape(1, -1).astype(jnp.float32)
    if b.shape[1] != Np:
        b = jnp.pad(b, ((0, 0), (0, Np - b.shape[1])))

    grid = (_cdiv(M, TM), _cdiv(n_out, TN), Kp // TK)
    return pl.pallas_call(
        functools.partial(_gemm_kernel, relu=relu, k_rem=K % TK),
        out_shape=jax.ShapeDtypeStruct((M, n_out), out_dtype),
        grid=grid,
        in_specs=[
            pl.BlockSpec((TM, TK), lambda i, j, k: (i, k)),
            pl.BlockSpec((TK, TN), lambda i, j, k: (k, j)),
            pl.BlockSpec((1, TN), lambda i, j, k: (0, j)),
        ],
        out_specs=pl.BlockSpec((TM, TN), lambda i, j, k: (i, j)),
        scratch_shapes=[pltpu.VMEM((TM, TN), jnp.float32)],
        compiler_params=pltpu.CompilerParams(
            dimension_semantics=("parallel", "parallel", "arbitrary"),
            vmem_limit_bytes=_VMEM_LIMIT),
    )(x, w, b)


# --------------------------------------------------------------------------
# Convolution (BasicConv2d = conv + folded-BN bias + ReLU) via im2col + GEMM.
# --------------------------------------------------------------------------
@functools.partial(jax.jit,
                   static_argnames=("kh", "kw", "stride", "pad", "n_out"))
def conv_gemm(x, wmat, bias, *, kh, kw, stride, pad, n_out):
    sh, sw = stride
    ph, pw = pad
    x = x.astype(ACT_DTYPE)                       # bf16 before im2col slicing
    if ph or pw:
        x = jnp.pad(x, ((0, 0), (ph, ph), (pw, pw), (0, 0)))
    N, H, W, C = x.shape
    Ho = (H - kh) // sh + 1
    Wo = (W - kw) // sw + 1
    if kh == 1 and kw == 1 and sh == 1 and sw == 1:
        patches = x.reshape(N * H * W, C)         # no im2col for 1x1 convs
    else:
        # TODO(synk): stream the taps straight from the activation instead of
        # materializing the kh*kw-wide patches matrix.
        cols = []
        for dy in range(kh):
            for dx in range(kw):
                cols.append(jax.lax.slice(
                    x, (0, dy, dx, 0),
                    (N, dy + (Ho - 1) * sh + 1, dx + (Wo - 1) * sw + 1, C),
                    (1, sh, sw, 1)))
        patches = jnp.concatenate(cols, axis=-1).reshape(
            N * Ho * Wo, kh * kw * C)
    out = gemm_bias_act(patches, wmat, bias, relu=True, n_out=n_out,
                        out_dtype=ACT_DTYPE)
    return out.reshape(N, Ho, Wo, n_out)


# --------------------------------------------------------------------------
# Pooling kernels.
# --------------------------------------------------------------------------
def _avgpool9_kernel(x_ref, o_ref):
    # 3x3 / stride-1 / pad-1 average pool, count_include_pad=True (/9
    # everywhere) -- matches F.avg_pool2d defaults in the Mixed blocks.
    # Separable: 3-tap sum over H (H is neither lane nor sublane -> cheap
    # slices), then 3-tap sum over W; zero-padded edges handled by concat.
    _, H, W, _ = o_ref.shape
    x = x_ref[0].astype(jnp.float32)
    vert = jnp.concatenate(
        [(x[0] + x[1])[None],
         x[:H - 2] + x[1:H - 1] + x[2:],
         (x[H - 2] + x[H - 1])[None]], axis=0)
    out = jnp.concatenate(
        [(vert[:, 0] + vert[:, 1])[:, None],
         vert[:, :W - 2] + vert[:, 1:W - 1] + vert[:, 2:],
         (vert[:, W - 2] + vert[:, W - 1])[:, None]], axis=1)
    o_ref[0] = (out * (1.0 / 9.0)).astype(o_ref.dtype)


@jax.jit
def avg_pool_3x3_s1_p1(x):
    N, H, W, C = x.shape
    return pl.pallas_call(
        _avgpool9_kernel,
        out_shape=jax.ShapeDtypeStruct((N, H, W, C), x.dtype),
        grid=(N,),
        in_specs=[pl.BlockSpec((1, H, W, C), lambda n: (n, 0, 0, 0))],
        out_specs=pl.BlockSpec((1, H, W, C), lambda n: (n, 0, 0, 0)),
        compiler_params=pltpu.CompilerParams(
            dimension_semantics=("parallel",)),
    )(x)


def _maxpool9_kernel(ee_ref, eo_ref, oe_ref, oo_ref, o_ref):
    # Even/odd phase-split 3x3 stride-2 max pool: every one of the 9 taps is a
    # contiguous slice of one of the 4 phase blocks (no strided access).
    _, Ho, Wo, _ = o_ref.shape
    ee = ee_ref[0]          # (Ho+1, Wo+1, C)
    eo = eo_ref[0]          # (Ho+1, Wo,   C)
    oe = oe_ref[0]          # (Ho,   Wo+1, C)
    oo = oo_ref[0]          # (Ho,   Wo,   C)
    m = ee[:Ho, :Wo, :]
    m = jnp.maximum(m, ee[:Ho, 1:Wo + 1, :])
    m = jnp.maximum(m, ee[1:Ho + 1, :Wo, :])
    m = jnp.maximum(m, ee[1:Ho + 1, 1:Wo + 1, :])
    m = jnp.maximum(m, eo[:Ho, :, :])
    m = jnp.maximum(m, eo[1:Ho + 1, :, :])
    m = jnp.maximum(m, oe[:, :Wo, :])
    m = jnp.maximum(m, oe[:, 1:Wo + 1, :])
    m = jnp.maximum(m, oo)
    o_ref[0] = m.astype(o_ref.dtype)


@jax.jit
def max_pool_3x3_s2(x):
    # TODO(synk): handle the even/odd phases in-kernel (strided pl.ds reads)
    # to avoid the XLA-side phase-slice copies.
    N, H, W, C = x.shape
    Ho = (H - 3) // 2 + 1
    Wo = (W - 3) // 2 + 1

    def phase(r0, c0, nr, nc):
        return jax.lax.slice(
            x, (0, r0, c0, 0),
            (N, r0 + 2 * (nr - 1) + 1, c0 + 2 * (nc - 1) + 1, C),
            (1, 2, 2, 1))

    ee = phase(0, 0, Ho + 1, Wo + 1)
    eo = phase(0, 1, Ho + 1, Wo)
    oe = phase(1, 0, Ho, Wo + 1)
    oo = phase(1, 1, Ho, Wo)
    return pl.pallas_call(
        _maxpool9_kernel,
        out_shape=jax.ShapeDtypeStruct((N, Ho, Wo, C), x.dtype),
        grid=(N,),
        in_specs=[
            pl.BlockSpec((1, Ho + 1, Wo + 1, C), lambda n: (n, 0, 0, 0)),
            pl.BlockSpec((1, Ho + 1, Wo, C), lambda n: (n, 0, 0, 0)),
            pl.BlockSpec((1, Ho, Wo + 1, C), lambda n: (n, 0, 0, 0)),
            pl.BlockSpec((1, Ho, Wo, C), lambda n: (n, 0, 0, 0)),
        ],
        out_specs=pl.BlockSpec((1, Ho, Wo, C), lambda n: (n, 0, 0, 0)),
        compiler_params=pltpu.CompilerParams(
            dimension_semantics=("parallel",)),
    )(ee, eo, oe, oo)


def _gap_kernel(x_ref, o_ref):
    o_ref[0, 0] = jnp.mean(x_ref[0].astype(jnp.float32), axis=0)


@jax.jit
def global_avg_pool(x):
    # AdaptiveAvgPool2d((1,1)) + view -> (N, C); tiled over the batch axis.
    N, H, W, C = x.shape
    x3 = x.reshape(N, H * W, C)
    out = pl.pallas_call(
        _gap_kernel,
        out_shape=jax.ShapeDtypeStruct((N, 1, C), jnp.float32),
        grid=(N,),
        in_specs=[pl.BlockSpec((1, H * W, C), lambda n: (n, 0, 0))],
        out_specs=pl.BlockSpec((1, 1, C), lambda n: (n, 0, 0)),
        compiler_params=pltpu.CompilerParams(
            dimension_semantics=("parallel",)),
    )(x3)
    return out.reshape(N, C)


# --------------------------------------------------------------------------
# Bilinear resize to 299x299 (align_corners=True), as two Pallas GEMMs.
# --------------------------------------------------------------------------
def _interp_matrix(in_size, out_size):
    m = np.zeros((out_size, in_size), dtype=np.float32)
    if out_size == 1 or in_size == 1:
        m[:, 0] = 1.0
        return m
    scale = (in_size - 1) / (out_size - 1)
    for i in range(out_size):
        src = i * scale
        i0 = min(int(np.floor(src)), in_size - 1)
        i1 = min(i0 + 1, in_size - 1)
        f = src - i0
        m[i, i0] += 1.0 - f
        m[i, i1] += f
    return m


@jax.jit
def bilinear_resize_299(x):
    # NOTE: the interpolation runs in bf16 on the MXU, so the preprocessing
    # fold into Conv2d_1a commutes to ~1e-3 relative accuracy (weights here
    # are synthetic anyway).
    N, H, W, C = x.shape
    Rh = jnp.asarray(_interp_matrix(H, 299))
    Rw = jnp.asarray(_interp_matrix(W, 299))
    t = jnp.transpose(x, (1, 0, 2, 3)).reshape(H, N * W * C)
    t = gemm_bias_act(Rh, t, jnp.zeros((1, t.shape[1]), jnp.float32),
                      relu=False, n_out=t.shape[1], out_dtype=ACT_DTYPE)
    t = t.reshape(299, N, W, C)
    t = jnp.transpose(t, (2, 1, 0, 3)).reshape(W, N * 299 * C)
    t = gemm_bias_act(Rw, t, jnp.zeros((1, t.shape[1]), jnp.float32),
                      relu=False, n_out=t.shape[1], out_dtype=ACT_DTYPE)
    t = t.reshape(299, N, 299, C)
    return jnp.transpose(t, (1, 2, 0, 3))         # (N, 299, 299, C)


# --------------------------------------------------------------------------
# Deterministic synthetic parameters (torchvision pretrained weights replaced;
# eval-mode BatchNorm folded into the conv bias).  GEMM matrices are reshaped,
# 128-padded and cast to bf16 ONCE at creation time.
# --------------------------------------------------------------------------
class ParamStore:
    def __init__(self, seed=0):
        self._key = jax.random.PRNGKey(seed)
        self._raw = {}
        self._gemm = {}
        self._count = 0

    def _raw_conv(self, name, cin, cout, kh, kw):
        if name not in self._raw:
            k_w = jax.random.fold_in(self._key, self._count); self._count += 1
            k_b = jax.random.fold_in(self._key, self._count); self._count += 1
            fan_in = kh * kw * cin
            w = (jax.random.normal(k_w, (kh, kw, cin, cout), jnp.float32)
                 * np.sqrt(2.0 / fan_in))
            b = jax.random.normal(k_b, (cout,), jnp.float32) * 0.01
            self._raw[name] = (w, b)
        return self._raw[name]

    def get_gemm(self, names, cin, couts, kh, kw, fold_affine=None):
        key = (names, int(cin), couts, int(kh), int(kw))
        if key not in self._gemm:
            ws, bs = [], []
            for nm, co in zip(names, couts):
                w, b = self._raw_conv(nm, cin, co, kh, kw)
                ws.append(w); bs.append(b)
            w = ws[0] if len(ws) == 1 else jnp.concatenate(ws, axis=-1)
            b = bs[0] if len(bs) == 1 else jnp.concatenate(bs)
            if fold_affine is not None:
                # conv(a*x + s) = conv_{w*a}(x) + sum_{hw,i} w[...,i,:]*s[i]
                # (exact: Conv2d_1a_3x3 is a valid conv, no zero padding).
                scale, shift = fold_affine
                b = b + jnp.einsum("hwio,i->o", w, shift)
                w = w * scale.reshape(1, 1, -1, 1)
            n_tot = int(sum(couts))
            kk = kh * kw * cin
            kp = _round_up(kk, 128)
            npad = _round_up(n_tot, 128)
            wmat = jnp.pad(w.reshape(kk, n_tot),
                           ((0, kp - kk), (0, npad - n_tot))).astype(jnp.bfloat16)
            bvec = jnp.pad(b, (0, npad - n_tot)).reshape(1, npad).astype(
                jnp.float32)
            self._gemm[key] = (wmat, bvec, n_tot)
        return self._gemm[key]


def basic_conv_multi(P, x, specs, k, stride=1, pad=0, fold_affine=None):
    """Several BasicConv2d branches sharing input + kernel geometry, run as a
    single fused GEMM (weights concatenated along cout), then split."""
    cin = x.shape[-1]
    kh, kw = (k, k) if isinstance(k, int) else k
    sh, sw = (stride, stride) if isinstance(stride, int) else stride
    ph, pw = (pad, pad) if isinstance(pad, int) else pad
    names = tuple(n for n, _ in specs)
    couts = tuple(int(c) for _, c in specs)
    wmat, bias, n_tot = P.get_gemm(names, cin, couts, kh, kw,
                                   fold_affine=fold_affine)
    y = conv_gemm(x, wmat, bias, kh=kh, kw=kw, stride=(sh, sw),
                  pad=(ph, pw), n_out=n_tot)
    if len(specs) == 1:
        return [y]
    splits = [int(s) for s in np.cumsum(couts)[:-1]]
    return jnp.split(y, splits, axis=-1)


def basic_conv(P, x, name, cout, k, stride=1, pad=0, fold_affine=None):
    return basic_conv_multi(P, x, [(name, cout)], k, stride=stride, pad=pad,
                            fold_affine=fold_affine)[0]


# --------------------------------------------------------------------------
# Inception blocks (torchvision inception_v3 topology).
# --------------------------------------------------------------------------
def inception_a(P, x, pre, pool_features):
    b1, b5, bd = basic_conv_multi(
        P, x, [(pre + ".b1x1", 64), (pre + ".b5x5_1", 48),
               (pre + ".b3x3dbl_1", 64)], 1)
    b5 = basic_conv(P, b5, pre + ".b5x5_2", 64, 5, pad=2)
    bd = basic_conv(P, bd, pre + ".b3x3dbl_2", 96, 3, pad=1)
    bd = basic_conv(P, bd, pre + ".b3x3dbl_3", 96, 3, pad=1)
    bp = avg_pool_3x3_s1_p1(x)
    bp = basic_conv(P, bp, pre + ".bpool", pool_features, 1)
    return jnp.concatenate([b1, b5, bd, bp], axis=-1)


def inception_b(P, x, pre):
    b3 = basic_conv(P, x, pre + ".b3x3", 384, 3, stride=2)
    bd = basic_conv(P, x, pre + ".b3x3dbl_1", 64, 1)
    bd = basic_conv(P, bd, pre + ".b3x3dbl_2", 96, 3, pad=1)
    bd = basic_conv(P, bd, pre + ".b3x3dbl_3", 96, 3, stride=2)
    bp = max_pool_3x3_s2(x)
    return jnp.concatenate([b3, bd, bp], axis=-1)


def inception_c(P, x, pre, c7):
    b1, b7, bd = basic_conv_multi(
        P, x, [(pre + ".b1x1", 192), (pre + ".b7x7_1", c7),
               (pre + ".b7x7dbl_1", c7)], 1)
    b7 = basic_conv(P, b7, pre + ".b7x7_2", c7, (1, 7), pad=(0, 3))
    b7 = basic_conv(P, b7, pre + ".b7x7_3", 192, (7, 1), pad=(3, 0))
    bd = basic_conv(P, bd, pre + ".b7x7dbl_2", c7, (7, 1), pad=(3, 0))
    bd = basic_conv(P, bd, pre + ".b7x7dbl_3", c7, (1, 7), pad=(0, 3))
    bd = basic_conv(P, bd, pre + ".b7x7dbl_4", c7, (7, 1), pad=(3, 0))
    bd = basic_conv(P, bd, pre + ".b7x7dbl_5", 192, (1, 7), pad=(0, 3))
    bp = avg_pool_3x3_s1_p1(x)
    bp = basic_conv(P, bp, pre + ".bpool", 192, 1)
    return jnp.concatenate([b1, b7, bd, bp], axis=-1)


def inception_d(P, x, pre):
    b3, b7 = basic_conv_multi(
        P, x, [(pre + ".b3x3_1", 192), (pre + ".b7x7x3_1", 192)], 1)
    b3 = basic_conv(P, b3, pre + ".b3x3_2", 320, 3, stride=2)
    b7 = basic_conv(P, b7, pre + ".b7x7x3_2", 192, (1, 7), pad=(0, 3))
    b7 = basic_conv(P, b7, pre + ".b7x7x3_3", 192, (7, 1), pad=(3, 0))
    b7 = basic_conv(P, b7, pre + ".b7x7x3_4", 192, 3, stride=2)
    bp = max_pool_3x3_s2(x)
    return jnp.concatenate([b3, b7, bp], axis=-1)


def inception_e(P, x, pre):
    b1, b3, bd = basic_conv_multi(
        P, x, [(pre + ".b1x1", 320), (pre + ".b3x3_1", 384),
               (pre + ".b3x3dbl_1", 448)], 1)
    b3a = basic_conv(P, b3, pre + ".b3x3_2a", 384, (1, 3), pad=(0, 1))
    b3b = basic_conv(P, b3, pre + ".b3x3_2b", 384, (3, 1), pad=(1, 0))
    b3 = jnp.concatenate([b3a, b3b], axis=-1)
    bd = basic_conv(P, bd, pre + ".b3x3dbl_2", 384, 3, pad=1)
    bda = basic_conv(P, bd, pre + ".b3x3dbl_3a", 384, (1, 3), pad=(0, 1))
    bdb = basic_conv(P, bd, pre + ".b3x3dbl_3b", 384, (3, 1), pad=(1, 0))
    bd = jnp.concatenate([bda, bdb], axis=-1)
    bp = avg_pool_3x3_s1_p1(x)
    bp = basic_conv(P, bp, pre + ".bpool", 192, 1)
    return jnp.concatenate([b1, b3, bd, bp], axis=-1)


MEAN = jnp.asarray([0.485, 0.456, 0.406], jnp.float32)
STD = jnp.asarray([0.229, 0.224, 0.225], jnp.float32)


def inception_v3_forward(P, x_nchw):
    x = jnp.transpose(x_nchw, (0, 2, 3, 1)).astype(jnp.float32)  # NCHW -> NHWC
    # Preprocessing ((x+1)/2 - mean)/std is a per-channel affine; it commutes
    # with align_corners=True bilinear resize (interp rows sum to 1), so it is
    # folded into Conv2d_1a_3x3's weights/bias below.
    if x.shape[1] != 299 or x.shape[2] != 299:
        x = bilinear_resize_299(x)
    scale = 0.5 / STD
    shift = (0.5 - MEAN) / STD
    # block1
    x = basic_conv(P, x, "Conv2d_1a_3x3", 32, 3, stride=2,
                   fold_affine=(scale, shift))
    x = basic_conv(P, x, "Conv2d_2a_3x3", 32, 3)
    x = basic_conv(P, x, "Conv2d_2b_3x3", 64, 3, pad=1)
    x = max_pool_3x3_s2(x)
    # block2
    x = basic_conv(P, x, "Conv2d_3b_1x1", 80, 1)
    x = basic_conv(P, x, "Conv2d_4a_3x3", 192, 3)
    x = max_pool_3x3_s2(x)
    # block3
    x = inception_a(P, x, "Mixed_5b", 32)
    x = inception_a(P, x, "Mixed_5c", 64)
    x = inception_a(P, x, "Mixed_5d", 64)
    x = inception_b(P, x, "Mixed_6a")
    x = inception_c(P, x, "Mixed_6b", 128)
    x = inception_c(P, x, "Mixed_6c", 160)
    x = inception_c(P, x, "Mixed_6d", 160)
    x = inception_c(P, x, "Mixed_6e", 192)
    # block4
    x = inception_d(P, x, "Mixed_7a")
    x = inception_e(P, x, "Mixed_7b")
    x = inception_e(P, x, "Mixed_7c")
    return global_avg_pool(x)        # (N, 2048) float32


if __name__ == "__main__":
    key = jax.random.PRNGKey(0)
    x = jax.random.uniform(key, (2, 3, 16, 16), jnp.float32,
                           minval=-1.0, maxval=1.0)
    P = ParamStore(seed=0)
    out = inception_v3_forward(P, x)
    out = jax.block_until_ready(out)
    assert out.shape == (2, 2048), out.shape
    assert bool(jnp.all(jnp.isfinite(out)))
    print("KERNEL_OK")
</pallas_src>

<mosaic_0001>
module attributes {stable_mosaic.version = 11 : i64} {
  func.func @_gemm_kernel(%arg0: i32, %arg1: i32, %arg2: i32, %arg3: memref<160x128xbf16, #tpu.memory_space<vmem>>, %arg4: memref<128x128xbf16, #tpu.memory_space<vmem>>, %arg5: memref<1x128xf32, #tpu.memory_space<vmem>>, %arg6: memref<160x128xbf16, #tpu.memory_space<vmem>>, %arg7: memref<160x128xf32, #tpu.memory_space<vmem>>) attributes {dimension_semantics = [#tpu.dimension_semantics<parallel>, #tpu.dimension_semantics<parallel>, #tpu.dimension_semantics<arbitrary>], iteration_bounds = array<i64: 2, 1, 1>, scalar_prefetch = 0 : i64, scratch_operands = 1 : i64, tpu.core_type = #tpu.core_type<tc>, window_params = [{transform_indices = @transform_0, window_bounds = array<i64: 160, 128>}, {transform_indices = @transform_1, window_bounds = array<i64: 128, 128>}, {transform_indices = @transform_2, window_bounds = array<i64: 1, 128>}, {transform_indices = @transform_3, window_bounds = array<i64: 160, 128>}]} {
    %c0_i32 = arith.constant 0 : i32
    %0 = arith.cmpi eq, %arg2, %c0_i32 : i32
    %1 = arith.extui %0 : i1 to i32
    %c0_i32_0 = arith.constant 0 : i32
    %2 = arith.cmpi ne, %1, %c0_i32_0 : i32
    scf.if %2 {
      %c0_12 = arith.constant 0 : index
      %c0_13 = arith.constant 0 : index
      %20 = vector.load %arg5[%c0_12, %c0_13] : memref<1x128xf32, #tpu.memory_space<vmem>>, vector<1x128xf32>
      %21 = vector.shape_cast %20 : vector<1x128xf32> to vector<1x128xf32>
      %22 = vector.broadcast %21 : vector<1x128xf32> to vector<160x128xf32>
      %c0_14 = arith.constant 0 : index
      %c0_15 = arith.constant 0 : index
      %23 = vector.load %arg7[%c0_14, %c0_15] : memref<160x128xf32, #tpu.memory_space<vmem>>, vector<160x128xf32>
      tpu.vector_store %arg7[%c0_14, %c0_15], %22 {strides = array<i32>} : memref<160x128xf32, #tpu.memory_space<vmem>>, vector<160x128xf32>,
    } else {
    }
    %c0 = arith.constant 0 : index
    %c0_1 = arith.constant 0 : index
    %3 = vector.load %arg3[%c0, %c0_1] : memref<160x128xbf16, #tpu.memory_space<vmem>>, vector<160x128xbf16>
    %4 = tpu.iota {dimensions = array<i32: 1>} : vector<160x128xi32>
    %c0_i32_2 = arith.constant 0 : i32
    %5 = arith.cmpi slt, %arg2, %c0_i32_2 : i32
    %c16_i32 = arith.constant 16 : i32
    %6 = vector.broadcast %c16_i32 : i32 to vector<160x128xi32>
    %7 = arith.cmpi slt, %4, %6 : vector<160x128xi32>
    %8 = vector.broadcast %5 : i1 to vector<160x128xi1>
    %9 = arith.ori %8, %7 : vector<160x128xi1>
    %cst = arith.constant 0.000000e+00 : bf16
    %10 = vector.broadcast %cst : bf16 to vector<160x128xbf16>
    %11 = arith.select %9, %3, %10 : vector<160x128xi1>, vector<160x128xbf16>
    %c0_3 = arith.constant 0 : index
    %c0_4 = arith.constant 0 : index
    %12 = vector.load %arg7[%c0_3, %c0_4] : memref<160x128xf32, #tpu.memory_space<vmem>>, vector<160x128xf32>
    %c0_5 = arith.constant 0 : index
    %c0_6 = arith.constant 0 : index
    %13 = vector.load %arg4[%c0_5, %c0_6] : memref<128x128xbf16, #tpu.memory_space<vmem>>, vector<128x128xbf16>
    %cst_7 = arith.constant dense<0.000000e+00> : vector<160x128xf32>
    %14 = tpu.matmul %11, %13, %cst_7 {dimension_numbers = #tpu.dot_dimension_numbers<[1], [0], [0], [1], [0, 0, 1, 1], [], []>} : vector<160x128xbf16>, vector<128x128xbf16>, vector<160x128xf32> -> vector<160x128xf32>
    %15 = arith.addf %12, %14 : vector<160x128xf32>
    %c0_8 = arith.constant 0 : index
    %c0_9 = arith.constant 0 : index
    %16 = vector.load %arg7[%c0_8, %c0_9] : memref<160x128xf32, #tpu.memory_space<vmem>>, vector<160x128xf32>
    tpu.vector_store %arg7[%c0_8, %c0_9], %15 {strides = array<i32>} : memref<160x128xf32, #tpu.memory_space<vmem>>, vector<160x128xf32>,
    %c0_i32_10 = arith.constant 0 : i32
    %17 = arith.cmpi eq, %arg2, %c0_i32_10 : i32
    %18 = arith.extui %17 : i1 to i32
    %c0_i32_11 = arith.constant 0 : i32
    %19 = arith.cmpi ne, %18, %c0_i32_11 : i32
    scf.if %19 {
      %c0_12 = arith.constant 0 : index
      %c0_13 = arith.constant 0 : index
      %20 = vector.load %arg7[%c0_12, %c0_13] : memref<160x128xf32, #tpu.memory_space<vmem>>, vector<160x128xf32>
      %21 = arith.truncf %20 : vector<160x128xf32> to vector<160x128xbf16>
      %c0_14 = arith.constant 0 : index
      %c0_15 = arith.constant 0 : index
      %22 = vector.load %arg6[%c0_14, %c0_15] : memref<160x128xbf16, #tpu.memory_space<vmem>>, vector<160x128xbf16>
      tpu.vector_store %arg6[%c0_14, %c0_15], %21 {strides = array<i32>} : memref<160x128xbf16, #tpu.memory_space<vmem>>, vector<160x128xbf16>,
    } else {
    }
    return
  }
  func.func @transform_0(%arg0: i32, %arg1: i32, %arg2: i32) -> (i32, i32) {
    %c0_i32 = arith.constant 0 : i32
    return %arg0, %arg2 : i32, i32
  }
  func.func @transform_1(%arg0: i32, %arg1: i32, %arg2: i32) -> (i32, i32) {
    %c0_i32 = arith.constant 0 : i32
    return %arg2, %arg1 : i32, i32
  }
  func.func @transform_2(%arg0: i32, %arg1: i32, %arg2: i32) -> (i32, i32) {
    %c0_i32 = arith.constant 0 : i32
    %c0_i32_0 = arith.constant 0 : i32
    return %c0_i32, %arg1 : i32, i32
  }
  func.func @transform_3(%arg0: i32, %arg1: i32, %arg2: i32) -> (i32, i32) {
    %c0_i32 = arith.constant 0 : i32
    return %arg0, %arg1 : i32, i32
  }
}

</mosaic_0001>

<bundles_post_ra>
// kernel: gemm_bias_act.1
= control target key start
LH: loop header
LB: loop body
LE: loop exit
PB: predicated region body
PF: predicated region fallthrough
CT: control target
= control target key end

     0   :  { %s1562_s12 = smov 0   ;;  %s1564_s13 = smov 0   ;;  %s1830_s0 = inlined_call_operand.vmem [shape: bf16[299,16], index: 0, kind: input, shape index: {}]   ;;  %s1831_s1 = inlined_call_operand.vmem [shape: bf16[128,128], index: 1, kind: input, shape index: {}]   ;;  %s1832_s2 = inlined_call_operand.vmem [shape: f32[1,128], index: 2, kind: input, shape index: {}]   ;;  %s1833_s3 = inlined_call_operand.vmem [shape: bf16[299,96], index: 3, kind: output, shape index: {}]  }
   0x1   :  { %s1566_s14 = smov 0   ;;  %s1568_s15 = smov 0  }
   0x2   :  { %s1570_s16 = smov 0  }
   0x3 LB: > { %s1111_s17 = sadd.s32 4294967295, %s1508_s16   ;;  %s32_s18 = sadd.s32 1, %s1504_s15  ;;  %s1508_s16 = sphi %s1570_s16, %s13_s16   ;;  %s1504_s15 = sphi %s1568_s15, %s1843_s15   ;;  %s1500_s14 = sphi %s1566_s14, %s1842_s14   ;;  %s1496_s13 = sphi %s1564_s13, %s1841_s13   ;;  %s1492_s12 = sphi %s1562_s12, %s1840_s12  }
   0x4   : > { %p34_p0 = scmp.ge.s32.totalorder %s32_s18, 2  ;;  %s123_s19 = sadd.s32 1, %s1496_s13 }
   0x5   : > { %p133_p1 = scmp.ne.s32.totalorder %s1496_s13, %s1492_s12  ;;  %p134_p2 = scmp.eq.s32.totalorder %s1111_s17, 1 }
   0x6   : > { %s1845_s18 = smov (%p34_p0, %s32_s18), 0  ;;  %p1117_p4 = scmp.ge.s32.totalorder %s1508_s16, 1 }
   0x7   : > { %p1594_p3 = por %p134_p2, %p133_p1  ;;  %s118_s21 = ssub.s32 %s1504_s15, %s1845_s18 }
   0x8   : > { %p196_p5 = scmp.lt.s32.totalorder %s1508_s16, 3  ;;  %p121_p6 = scmp.eq.s32.totalorder %s118_s21, 0 }
   0xa   : > { %p197_p7 = pnand %p1117_p4, %p196_p5 }
   0xb   : > { %s1603_s22 = scalar_select %p121_p6, %s1496_s13, %s123_s19  }
   0xc   : > { %200 = sbr.rel (%p197_p7) target bundleno = 356 (0x164), region = 32  ;;  %v1426_v0 = vld [vmem:[%s1831_s1] sm:$0xff] (!%p197_p7)   ;;  %v323_v1 = vlaneseq (!%p197_p7)  ;;  %v1427_v2 = vld [vmem:[%s1831_s1 + $0x8] sm:$0xff] (!%p197_p7)   ;;  %v1428_v4 = vld [vmem:[%s1831_s1 + $0x10] sm:$0xff] (!%p197_p7)   ;;  %s234_s27 = sand.u32 (!%p197_p7), 1, %s1492_s12  }
   0xd   : > { %s1609_s25 = smul.u32 (!%p197_p7), 20, %s1500_s14  ;;  %1268 = vmatprep.subr.bf16.mxu0 (!%p197_p7), %v1426_v0  ;;  %1304 = vmatprep.subr.bf16.mxu1 (!%p197_p7), %v1426_v0  ;;  %v1429_v5 = vld [vmem:[%s1831_s1 + $0x18] sm:$0xff] (!%p197_p7)   ;;  %v1430_v16 = vld [vmem:[%s1831_s1 + $0x20] sm:$0xff] (!%p197_p7)   ;;  %v1431_v18 = vld [vmem:[%s1831_s1 + $0x28] sm:$0xff] (!%p197_p7)  }
   0xe   : > { %1269 = vmatpush3.bf16.msra.mxu0 (!%p197_p7), %v1426_v0  ;;  %1312 = vmatpush3.bf16.msra.mxu1 (!%p197_p7), %v1426_v0  ;;  %v324_v3 = vand.u32 (!%p197_p7), 127, %v323_v1  ;;  %v1432_v19 = vld [vmem:[%s1831_s1 + $0x30] sm:$0xff] (!%p197_p7)   ;;  %v1433_v20 = vld [vmem:[%s1831_s1 + $0x38] sm:$0xff] (!%p197_p7)   ;;  %v1119_v61 = vld [vmem:[%s1832_s2] ss:$0 sm:$0xff] (!%p197_p7) }
   0xf   : > { %p242_p8 = scmp.lt.s32.totalorder (!%p197_p7), %s1609_s25, 37  ;;  %1270 = vmatprep.subr.bf16.mxu0 (!%p197_p7), %v1427_v2  ;;  %1305 = vmatprep.subr.bf16.mxu1 (!%p197_p7), %v1427_v2 }
  0x10   : > { %vm326_vm0 = vcmp.lt.s32.totalorder (!%p197_p7), %v324_v3, 16 }
  0x11   : > { %vm1629_vm1 = vmpackc.low (!%p197_p7), %vm326_vm0, %vm326_vm0 }
  0x12   : > { %1271 = vmatpush3.bf16.msra.mxu0 (!%p197_p7), %v1427_v2  ;;  %1313 = vmatpush3.bf16.msra.mxu1 (!%p197_p7), %v1427_v2 }
  0x13   : > { %s243_s30 = scalar_select %p242_p8, %s1609_s25, 37  ;;  %1272 = vmatprep.subr.bf16.mxu0 %v1428_v4  ;;  %1306 = vmatprep.subr.bf16.mxu1 %v1428_v4 }
  0x14   : > { %s1190_s5 = smul.u32 (%p1594_p3), 80, %s1500_s14 }
  0x15   : > { %s1118_s4 = sshll.u32 %s243_s30, 2  ;;  %s1320_s30 = smul.u32 80, %s234_s27 }
  0x16   : > { %s1625_s9 = scalar_lea.vmem %s1830_s0, %s1118_s4  ;;  %1273 = vmatpush3.bf16.msra.mxu0 %v1428_v4  ;;  %1314 = vmatpush3.bf16.msra.mxu1 %v1428_v4  ;;  %s780_s4 = ssub.s32 (%p1594_p3), 38, %s1609_s25 }
  0x17   : > { %v303_v6 = vld [vmem:[%s1625_s9] sm:$0xf]  ;;  %v304_v7 = vld [vmem:[%s1625_s9 + $0x4] sm:$0xf]  ;;  %v315_v12 = vld [vmem:[%s1625_s9 + $0x30] sm:$0xf]  ;;  %1274 = vmatprep.subr.bf16.mxu0 %v1429_v5  ;;  %1307 = vmatprep.subr.bf16.mxu1 %v1429_v5  ;;  %s1726_s8 = scalar_lea.vmem (%p1594_p3), %s1833_s3, %s1190_s5  }
  0x18   : > { %v332_v9 = vsel %vm1629_vm1, %v303_v6, 0  ;;  %v333_v10 = vsel %vm1629_vm1, %v304_v7, 0  ;;  %v316_v13 = vld [vmem:[%s1625_s9 + $0x34] sm:$0xf]  ;;  %v344_v14 = vsel %vm1629_vm1, %v315_v12, 0  ;;  %s1707_s12 = scalar_lea.vmem [#allocation3], %s1320_s30  }
  0x19   : > { %v1120_v11 = vcombine.low %v332_v9, %v333_v10  ;;  %v345_v15 = vsel %vm1629_vm1, %v316_v13, 0  ;;  %v305_v21 = vld [vmem:[%s1625_s9 + $0x8] sm:$0xf]  ;;  %v306_v22 = vld [vmem:[%s1625_s9 + $0xc] sm:$0xf]  ;;  %p781_p9 = scmp.lt.s32.totalorder (%p1594_p3), %s780_s4, 20 }
  0x1a   : > { %v1126_v17 = vcombine.low %v344_v14, %v345_v15  ;;  %1275 = vmatpush3.bf16.msra.mxu0 %v1429_v5  ;;  %1315 = vmatpush3.bf16.msra.mxu1 %v1429_v5  ;;  %v317_v23 = vld [vmem:[%s1625_s9 + $0x38] sm:$0xf]  ;;  %v318_v24 = vld [vmem:[%s1625_s9 + $0x3c] sm:$0xf]  ;;  %v307_v25 = vld [vmem:[%s1625_s9 + $0x10] sm:$0xf] }
  0x1b   : > { %1284 = vmatprep.mubr.bf16.mxu0 %v1120_v11  ;;  %1276 = vmatprep.subr.bf16.mxu0 %v1430_v16  ;;  %v308_v26 = vld [vmem:[%s1625_s9 + $0x14] sm:$0xf]  ;;  %v319_v27 = vld [vmem:[%s1625_s9 + $0x40] sm:$0xf]  ;;  %v320_v28 = vld [vmem:[%s1625_s9 + $0x44] sm:$0xf] }
  0x1c   : > { %1296 = vmatprep.mubr.bf16.mxu1 %v1126_v17  ;;  %1308 = vmatprep.subr.bf16.mxu1 %v1430_v16  ;;  %v334_v29 = vsel %vm1629_vm1, %v305_v21, 0  ;;  %v335_v30 = vsel %vm1629_vm1, %v306_v22, 0  ;;  %v346_v31 = vsel %vm1629_vm1, %v317_v23, 0  ;;  %v347_v32 = vsel %vm1629_vm1, %v318_v24, 0  ;;  %v309_v40 = vld [vmem:[%s1625_s9 + $0x18] sm:$0xf] }
  0x1d   : > { %v336_v33 = vsel %vm1629_vm1, %v307_v25, 0  ;;  %v337_v34 = vsel %vm1629_vm1, %v308_v26, 0  ;;  %v348_v35 = vsel %vm1629_vm1, %v319_v27, 0  ;;  %v349_v36 = vsel %vm1629_vm1, %v320_v28, 0  ;;  %v310_v42 = vld [vmem:[%s1625_s9 + $0x1c] sm:$0xf] }
  0x1e   : > { %1277 = vmatpush3.bf16.msra.mxu0 %v1430_v16  ;;  %1316 = vmatpush3.bf16.msra.mxu1 %v1430_v16  ;;  %v1121_v37 = vcombine.low %v334_v29, %v335_v30  ;;  %v1127_v38 = vcombine.low %v346_v31, %v347_v32  ;;  %v1122_v39 = vcombine.low %v336_v33, %v337_v34  ;;  %v321_v43 = vld [vmem:[%s1625_s9 + $0x48] sm:$0xf]  ;;  %v322_v44 = vld [vmem:[%s1625_s9 + $0x4c] sm:$0xf]  ;;  %v311_v45 = vld [vmem:[%s1625_s9 + $0x20] sm:$0xf] }
  0x1f   : > { %1278 = vmatprep.subr.bf16.mxu0 %v1431_v18  ;;  %1309 = vmatprep.subr.bf16.mxu1 %v1431_v18  ;;  %v1128_v41 = vcombine.low %v348_v35, %v349_v36  ;;  %v312_v46 = vld [vmem:[%s1625_s9 + $0x24] sm:$0xf]  ;;  %v338_v47 = vsel %vm1629_vm1, %v309_v40, 0  ;;  %v339_v48 = vsel %vm1629_vm1, %v310_v42, 0  ;;  %v350_v49 = vsel %vm1629_vm1, %v321_v43, 0 }
  0x20   : > { %v351_v50 = vsel %vm1629_vm1, %v322_v44, 0  ;;  %v340_v51 = vsel %vm1629_vm1, %v311_v45, 0  ;;  %v341_v52 = vsel %vm1629_vm1, %v312_v46, 0  ;;  %v1123_v53 = vcombine.low %v338_v47, %v339_v48  ;;  %v313_v56 = vld [vmem:[%s1625_s9 + $0x28] sm:$0xf] }
  0x21   : > { %v1129_v54 = vcombine.low %v350_v49, %v351_v50  ;;  %v1124_v55 = vcombine.low %v340_v51, %v341_v52  ;;  %v314_v57 = vld [vmem:[%s1625_s9 + $0x2c] sm:$0xf]  ;;  %v342_v58 = vsel %vm1629_vm1, %v313_v56, 0 }
  0x22   : > { %1279 = vmatpush3.bf16.msra.mxu0 %v1431_v18  ;;  %1317 = vmatpush3.bf16.msra.mxu1 %v1431_v18  ;;  %v343_v59 = vsel %vm1629_vm1, %v314_v57, 0 }
  0x23   : > { %1280 = vmatprep.subr.bf16.mxu0 %v1432_v19  ;;  %1310 = vmatprep.subr.bf16.mxu1 %v1432_v19  ;;  %v1125_v60 = vcombine.low %v342_v58, %v343_v59 }
  0x26   : > { %1281 = vmatpush3.bf16.msra.mxu0 %v1432_v19  ;;  %1318 = vmatpush3.bf16.msra.mxu1 %v1432_v19 }
  0x27   : > { %1282 = vmatprep.subr.bf16.mxu0 %v1433_v20  ;;  %1311 = vmatprep.subr.bf16.mxu1 %v1433_v20 }
  0x2a   : > { %1283 = vmatpush3.bf16.msra.mxu0 %v1433_v20  ;;  %1319 = vmatpush3.bf16.msra.mxu1 %v1433_v20 }
  0x2d   : > { %1285 = vmatmul.mubr.bf16.vlgmr.msra.gmra.mrb[0].mxu0 %v1121_v37  ;;  %1297 = vmatmul.mubr.bf16.vlgmr.msra.gmra.mrb[0].mxu1 %v1127_v38 }
  0x2e   : > { %1288 = vmatprep.mubr.bf16.mxu0 %v1122_v39  ;;  %1300 = vmatprep.mubr.bf16.mxu1 %v1128_v41 }
  0x35   : > { %1289 = vmatmul.mubr.bf16.gmra.mrb[4].mxu0 %v1123_v53  ;;  %1301 = vmatmul.mubr.bf16.gmra.mrb[4].mxu1 %v1129_v54 }
  0x36   : > { %1292 = vmatprep.mubr.bf16.mxu0 %v1124_v55 }
  0x3d   : > { %1293 = vmatmul.mubr.bf16.gmra.mrb[8].mxu0 %v1125_v60 }
 0x100   : > { %v1286_v62 = vpop.f32.mrb[0].mxu0  ;;  %v1298_v63 = vpop.f32.mrb[0].mxu1 }
 0x101   : > { %v530_v0 = vpop.f32.mrb[1].mxu0  ;;  %v623_v1 = vadd.f32 %v1298_v63, %v1119_v61  ;;  %v578_v2 = vpop.f32.mrb[1].mxu1  ;;  %v611_v6 = vadd.f32 %v1286_v62, %v1119_v61 }
 0x102   : > { %v1287_v3 = vpop.f32.mrb[2].mxu0  ;;  %v621_v4 = vadd.f32 %v1119_v61, %v578_v2  ;;  %v1299_v5 = vpop.f32.mrb[2].mxu1  ;;  %v609_v11 = vadd.f32 %v1119_v61, %v530_v0 }
 0x103   : > { %v612_v7 = vadd.f32 %v1287_v3, %v1119_v61  ;;  %v533_v8 = vpop.f32.mrb[3].mxu0  ;;  %v624_v9 = vadd.f32 %v1299_v5, %v1119_v61  ;;  %v581_v10 = vpop.f32.mrb[3].mxu1 }
 0x104   : > { %v610_v12 = vadd.f32 %v1119_v61, %v533_v8  ;;  %v622_v13 = vadd.f32 %v1119_v61, %v581_v10 }
 0x105   : > { %v1199_v14 = vpack.c.bf16 %v612_v7, %v611_v6  ;;  %v1229_v15 = vpack.c.bf16 %v624_v9, %v623_v1 }
 0x106   : > { %v1194_v16 = vpack.c.bf16 %v610_v12, %v609_v11  ;;  %v1224_v17 = vpack.c.bf16 %v622_v13, %v621_v4 }
 0x107   : > { %1241 = vst [vmem:[%s1707_s12 + $0x8] sm:$0xff] %v1199_v14   ;;  %1247 = vst [vmem:[%s1707_s12 + $0x38] sm:$0xff] %v1229_v15  }
 0x108   : > { %1195 = vst [vmem:[%s1707_s12] sm:$0xff] %v1194_v16   ;;  %v1290_v18 = vpop.f32.mrb[4].mxu0  ;;  %1246 = vst [vmem:[%s1707_s12 + $0x30] sm:$0xff] %v1224_v17   ;;  %v1302_v19 = vpop.f32.mrb[4].mxu1 }
 0x109   : > { %v546_v20 = vpop.f32.mrb[5].mxu0  ;;  %v627_v21 = vadd.f32 %v1302_v19, %v1119_v61  ;;  %v594_v22 = vpop.f32.mrb[5].mxu1  ;;  %v615_v26 = vadd.f32 %v1290_v18, %v1119_v61 }
 0x10a   : > { %v1291_v23 = vpop.f32.mrb[6].mxu0  ;;  %v625_v24 = vadd.f32 %v1119_v61, %v594_v22  ;;  %v1303_v25 = vpop.f32.mrb[6].mxu1  ;;  %v613_v31 = vadd.f32 %v1119_v61, %v546_v20 }
 0x10b   : > { %v616_v27 = vadd.f32 %v1291_v23, %v1119_v61  ;;  %v549_v28 = vpop.f32.mrb[7].mxu0  ;;  %v628_v29 = vadd.f32 %v1303_v25, %v1119_v61  ;;  %v597_v30 = vpop.f32.mrb[7].mxu1 }
 0x10c   : > { %v614_v32 = vadd.f32 %v1119_v61, %v549_v28  ;;  %v626_v33 = vadd.f32 %v1119_v61, %v597_v30 }
 0x10d   : > { %v1209_v34 = vpack.c.bf16 %v616_v27, %v615_v26  ;;  %v1239_v35 = vpack.c.bf16 %v628_v29, %v627_v21 }
 0x10e   : > { %v1204_v36 = vpack.c.bf16 %v614_v32, %v613_v31  ;;  %v1234_v37 = vpack.c.bf16 %v626_v33, %v625_v24 }
 0x10f   : > { %1243 = vst [vmem:[%s1707_s12 + $0x18] sm:$0xff] %v1209_v34   ;;  %1249 = vst [vmem:[%s1707_s12 + $0x48] sm:$0xff] %v1239_v35  }
 0x110   : > { %1242 = vst [vmem:[%s1707_s12 + $0x10] sm:$0xff] %v1204_v36   ;;  %v1294_v38 = vpop.f32.mrb[8].mxu0  ;;  %1248 = vst [vmem:[%s1707_s12 + $0x40] sm:$0xff] %v1234_v37  }
 0x111   : > { %v562_v39 = vpop.f32.mrb[9].mxu0  ;;  %v619_v41 = vadd.f32 %v1294_v38, %v1119_v61 }
 0x112   : > { %v1295_v40 = vpop.f32.mrb[10].mxu0  ;;  %v617_v44 = vadd.f32 %v1119_v61, %v562_v39  ;;  %778 = sbr.rel (!%p1594_p3) target bundleno = 356 (0x164), region = 44 }
 0x113   : > { %v620_v42 = vadd.f32 %v1295_v40, %v1119_v61  ;;  %v565_v43 = vpop.f32.mrb[11].mxu0 }
 0x114   : > { %v618_v45 = vadd.f32 %v1119_v61, %v565_v43 }
 0x115   : > { %v1219_v46 = vpack.c.bf16 %v620_v42, %v619_v41 }
 0x116   : > { %v1214_v47 = vpack.c.bf16 %v618_v45, %v617_v44 }
 0x117   : > { %1245 = vst [vmem:[%s1707_s12 + $0x28] sm:$0xff] %v1219_v46  }
 0x118   : > { %1244 = vst [vmem:[%s1707_s12 + $0x20] sm:$0xff] %v1214_v47  }
 0x119   : > { %s1847_s4 = smov (!%p781_p9, %s780_s4), 20 }
 0x11a   : > { %s1158_s9 = sshll.u32 %s1847_s4, 6 }
 0x11b   : > { %p1161_p10 = scmp.eq.s32.totalorder %s1158_s9, 0 }
 0x11c   : > { %1434 = sdivrem.u32 (!%p1161_p10), %s1847_s4, 20 }
 0x11d   : > { %790 = sbr.rel (%p1161_p10) target bundleno = 356 (0x164), region = 48 }
 0x125   : > { %s1732_s20 = spop.drf %1434 }
 0x126   : > { %p1162_p11 = scmp.le.s32.totalorder %s1732_s20, 0 }
 0x127   : > { %s1837_s14 = smov (!%p1162_p11), %s1726_s8  ;;  %s1838_s25 = smov (!%p1162_p11), %s1707_s12 }
 0x128   : > { %1038 = sbr.rel (%p1162_p11) target bundleno = 327 (0x147), region = 126  ;;  %s1741_s10 = smov (!%p1162_p11), 0  }
 0x129   : > { %s1743_s11 = smov (!%p1162_p11), 0  }
 0x12f LB: >> { %v807_v48 = vld [vmem:[%s1516_s25] sm:$0xf]  ;;  %v809_v49 = vld [vmem:[%s1516_s25 + $0x4] sm:$0xf]  ;;  %v811_v50 = vld [vmem:[%s1516_s25 + $0x8] sm:$0xf]  ;;  %s1524_s11 = sphi %s1743_s11, %s801_s11   ;;  %s1520_s10 = sphi %s1741_s10, %s1839_s10   ;;  %s1516_s25 = sphi %s1838_s25, %s852_s25   ;;  %s1512_s14 = sphi %s1837_s14, %s853_s14  }
 0x130   : >> { %808 = vst [vmem:[%s1512_s14] sm:$0xf] %v807_v48  ;;  %810 = vst [vmem:[%s1512_s14 + $0x4] sm:$0xf] %v809_v49  ;;  %v813_v51 = vld [vmem:[%s1516_s25 + $0xc] sm:$0xf]  ;;  %s847_s17 = sadd.s32 1, %s1520_s10 }
 0x131   : >> { %812 = vst [vmem:[%s1512_s14 + $0x8] sm:$0xf] %v811_v50  ;;  %v815_v52 = vld [vmem:[%s1516_s25 + $0x10] sm:$0xf]  ;;  %v817_v53 = vld [vmem:[%s1516_s25 + $0x14] sm:$0xf]  ;;  %p848_p12 = scmp.ge.s32.totalorder %s847_s17, %s1732_s20 }
 0x132   : >> { %814 = vst [vmem:[%s1512_s14 + $0xc] sm:$0xf] %v813_v51  ;;  %816 = vst [vmem:[%s1512_s14 + $0x10] sm:$0xf] %v815_v52  ;;  %v819_v54 = vld [vmem:[%s1516_s25 + $0x18] sm:$0xf] }
 0x133   : >> { %818 = vst [vmem:[%s1512_s14 + $0x14] sm:$0xf] %v817_v53  ;;  %v821_v55 = vld [vmem:[%s1516_s25 + $0x1c] sm:$0xf]  ;;  %v823_v56 = vld [vmem:[%s1516_s25 + $0x20] sm:$0xf] }
 0x134   : >> { %820 = vst [vmem:[%s1512_s14 + $0x18] sm:$0xf] %v819_v54  ;;  %822 = vst [vmem:[%s1512_s14 + $0x1c] sm:$0xf] %v821_v55  ;;  %v825_v57 = vld [vmem:[%s1516_s25 + $0x24] sm:$0xf] }
 0x135   : >> { %824 = vst [vmem:[%s1512_s14 + $0x20] sm:$0xf] %v823_v56  ;;  %v827_v58 = vld [vmem:[%s1516_s25 + $0x28] sm:$0xf]  ;;  %v829_v59 = vld [vmem:[%s1516_s25 + $0x2c] sm:$0xf] }
 0x136   : >> { %826 = vst [vmem:[%s1512_s14 + $0x24] sm:$0xf] %v825_v57  ;;  %828 = vst [vmem:[%s1512_s14 + $0x28] sm:$0xf] %v827_v58  ;;  %v831_v60 = vld [vmem:[%s1516_s25 + $0x30] sm:$0xf] }
 0x137   : >> { %830 = vst [vmem:[%s1512_s14 + $0x2c] sm:$0xf] %v829_v59  ;;  %v833_v61 = vld [vmem:[%s1516_s25 + $0x34] sm:$0xf]  ;;  %v835_v62 = vld [vmem:[%s1516_s25 + $0x38] sm:$0xf] }
 0x138   : >> { %832 = vst [vmem:[%s1512_s14 + $0x30] sm:$0xf] %v831_v60  ;;  %834 = vst [vmem:[%s1512_s14 + $0x34] sm:$0xf] %v833_v61  ;;  %v837_v63 = vld [vmem:[%s1516_s25 + $0x3c] sm:$0xf] }
 0x139   : >> { %836 = vst [vmem:[%s1512_s14 + $0x38] sm:$0xf] %v835_v62  ;;  %v839_v0 = vld [vmem:[%s1516_s25 + $0x40] sm:$0xf]  ;;  %v841_v1 = vld [vmem:[%s1516_s25 + $0x44] sm:$0xf] }
 0x13a   : >> { %838 = vst [vmem:[%s1512_s14 + $0x3c] sm:$0xf] %v837_v63  ;;  %840 = vst [vmem:[%s1512_s14 + $0x40] sm:$0xf] %v839_v0  ;;  %v843_v2 = vld [vmem:[%s1516_s25 + $0x48] sm:$0xf] }
 0x13b   : >> { %842 = vst [vmem:[%s1512_s14 + $0x44] sm:$0xf] %v841_v1  ;;  %v845_v3 = vld [vmem:[%s1516_s25 + $0x4c] sm:$0xf]  ;;  %844 = vst [vmem:[%s1512_s14 + $0x48] sm:$0xf] %v843_v2 }
 0x13c   : >> { %846 = vst [vmem:[%s1512_s14 + $0x4c] sm:$0xf] %v845_v3  ;;  %s1849_s17 = smov (%p848_p12, %s847_s17), 0  ;;  %s801_s11 = sadd.s32 1, %s1524_s11  }
 0x13d   : >> { %s850_s19 = smul.u32 80, %s1849_s17  ;;  %p800_p13 = scmp.ge.s32.totalorder %s801_s11, %s1732_s20 }
 0x13e   : >> { %s1839_s10 = smov %s1849_s17 }
 0x13f   : >> { %s852_s25 = scalar_lea.vmem %s1707_s12, %s850_s19 [#allocation3]   ;;  %s853_s14 = scalar_lea.vmem %s1726_s8, %s850_s19  }
 0x140   : > { %803 = sbr.rel (!%p800_p13) target bundleno = 303 (0x12f), region = 132 }
 0x147 PF: > { %1436 = sdivrem.u32 %s1847_s4, 20 }
 0x148   : > { %s1163_s21 = smul.u32 80, %s1732_s20 }
 0x14a   : > { %s858_s23 = scalar_lea.vmem %s1707_s12, %s1163_s21 [#allocation3]   ;;  %s860_s24 = scalar_lea.vmem %s1726_s8, %s1163_s21  }
 0x150   : > { %s1437_s26 = spop.drf %1436 }
 0x151   : > { %p1165_p0 = scmp.le.s32.totalorder %s1437_s26, 0 }
 0x152   : > { %s1526_s27 = smov (!%p1165_p0), %s860_s24   ;;  %s1530_s28 = smov (!%p1165_p0), %s858_s23  }
 0x153   : > { %1052 = sbr.rel (%p1165_p0) target bundleno = 356 (0x164), region = 137  ;;  %s1534_s29 = smov (!%p1165_p0), 0  }
 0x154   : > { %s1538_s30 = smov (!%p1165_p0), 0  }
 0x15a LB: >> { %v870_v4 = vld [vmem:[%s1532_s28] sm:$0xf]  ;;  %s872_s5 = sadd.s32 1, %s1536_s29  ;;  %s864_s30 = sadd.s32 1, %s1540_s30   ;;  %s1540_s30 = sphi %s1538_s30, %s864_s30   ;;  %s1536_s29 = sphi %s1534_s29, %s1535_s29   ;;  %s1532_s28 = sphi %s1530_s28, %s877_s28   ;;  %s1528_s27 = sphi %s1526_s27, %s878_s27  }
 0x15b   : >> { %871 = vst [vmem:[%s1528_s27] sm:$0xf] %v870_v4  ;;  %p873_p1 = scmp.ge.s32.totalorder %s872_s5, %s1437_s26  ;;  %p863_p2 = scmp.ge.s32.totalorder %s864_s30, %s1437_s26 }
 0x15d   : >> { %s1851_s5 = smov (%p873_p1, %s872_s5), 0  ;;  %866 = sbr.rel (!%p863_p2) target bundleno = 346 (0x15a), region = 143 }
 0x15e   : >> { %s1166_s12 = sshll.u32 %s1851_s5, 2  ;;  %s1535_s29 = smov %s1851_s5  }
 0x15f   : >> { %s877_s28 = scalar_lea.vmem %s858_s23, %s1166_s12 [#allocation3]   ;;  %s878_s27 = scalar_lea.vmem %s860_s24, %s1166_s12  }
 0x164 PF: > { %s13_s16 = sadd.s32 1, %s1508_s16   ;;  %s1840_s12 = smov %s1496_s13 }
 0x165   : > { %p10_p3 = scmp.ge.s32.totalorder %s13_s16, 4   ;;  %s1841_s13 = smov %s1603_s22 }
 0x166   : > { %s1842_s14 = smov %s1504_s15  ;;  %s1843_s15 = smov %s1845_s18 }
 0x167   :  { %12 = sbr.rel (!%p10_p3) target bundleno = 3 (0x3), region = 154 }

</bundles_post_ra>
